<compile_context>
chip_gen: v7x
topology: tpu7x:2x2x1
jax: 0.10.0
libtpu: 0.0.40
codegen_flags: <defaults>
</compile_context>

<pallas_src>
import math

import jax
import jax.numpy as jnp
import numpy as np
from jax import lax
from jax.experimental import pallas as pl
from jax.experimental.pallas import tpu as pltpu


def _round_up(a, b):
    return (a + b - 1) // b * b


def _choose_row_tile(n_rows_total, per_row_bytes, fixed_bytes, out_itemsize,
                     *, vmem_budget_bytes=10 << 20, max_tile=4096):
    """Row-tile size: multiple of the output sublane packing, as large as the
    VMEM budget allows (amortizes ~0.35 us/grid-step overhead), but capped so
    the grid has >= 2 steps when there are enough rows (v7x dual-TC sharding)."""
    sublane = {4: 8, 2: 16, 1: 32}.get(out_itemsize, 8)
    avail = max(vmem_budget_bytes - fixed_bytes, 128 * 1024)
    tr = max(sublane, (avail // max(per_row_bytes, 1)) // sublane * sublane)
    tr = min(tr, max_tile)
    n_rows = _round_up(max(n_rows_total, 1), sublane)
    tr = min(tr, n_rows)
    if n_rows >= 2 * sublane:
        half = _round_up((n_rows + 1) // 2, sublane)
        tr = min(tr, half)
    return tr


def _build_table(d_model, max_len, denom):
    """Host-side table, built exactly like the PyTorch module."""
    pos = np.arange(max_len, dtype=np.float32)[:, None]
    div = np.exp(-np.arange(0, d_model, 2, dtype=np.float32) / d_model
                 * math.log(float(denom)))
    tbl = np.zeros((max_len, d_model), np.float32)
    tbl[:, 0::2] = np.sin(div * pos)
    tbl[:, 1::2] = np.cos(div * pos)
    return jnp.asarray(tbl)


# ---------------------------------------------------------------------------
# Kernels
# ---------------------------------------------------------------------------

def _table_lookup_kernel(idx_ref, table_ref, o_ref):
    # idx_ref:   (TR, 1)            int32 positions for this row tile
    # table_ref: (max_len, d_model) f32   full sinusoid table (constant block)
    # o_ref:     (TR, d_model)      output tile
    tr = idx_ref.shape[0]
    max_len = table_ref.shape[0]
    ids = idx_ref[...]                                           # (TR, 1)
    iota = lax.broadcasted_iota(jnp.int32, (tr, max_len), 1)     # (TR, max_len)
    one_hot = (iota == ids).astype(jnp.float32)                  # MXU lhs
    res = jnp.dot(one_hot, table_ref[...],
                  preferred_element_type=jnp.float32,
                  precision=lax.Precision.HIGHEST)
    o_ref[...] = res.astype(o_ref.dtype)


def _sinusoid_recompute_kernel(idx_ref, sp_ref, o_ref):
    # idx_ref: (TR, 1)       int32 positions
    # sp_ref:  (2, d_model)  row 0 = scale = denom^(-2*(j//2)/d_model),
    #                        row 1 = phase = 0 (even j) / pi/2 (odd j)
    # o_ref:   (TR, d_model) output tile
    pos = idx_ref[...].astype(jnp.float32)                 # (TR, 1)
    arg = pos * sp_ref[0:1, :] + sp_ref[1:2, :]            # (TR, d_model) broadcast
    o_ref[...] = jnp.sin(arg).astype(o_ref.dtype)          # sin(a + pi/2) == cos(a)


# ---------------------------------------------------------------------------
# Wrapper
# ---------------------------------------------------------------------------

def sinusoidal_positional_embedding(x, d_model, max_len=128, denom=10000.0,
                                    *, out_dtype=jnp.float32, method="auto",
                                    vmem_budget_bytes=10 << 20):
    """Functional equivalent of SinusoidalPositionalEmbedding.forward(x).

    x: integer array of position indices (any shape), values in [0, max_len).
    Returns an array of shape x.shape + (d_model,) in `out_dtype`.
    (Use out_dtype=jnp.bfloat16 to halve HBM store traffic when the consumer
    accepts bf16; d_model that is a multiple of 128 keeps stores unmasked.)
    """
    orig_shape = x.shape
    n = int(math.prod(orig_shape)) if orig_shape else 1
    idx = x.reshape(n, 1).astype(jnp.int32)

    out_itemsize = jnp.dtype(out_dtype).itemsize
    table_bytes = max_len * d_model * 4

    if method == "auto":
        # Small table -> MXU one-hot lookup (keeps EUP/VPU idle, store-bound on
        # all chips incl. v7x).  Large max_len -> recompute (constant footprint).
        method = "table" if (max_len <= 512 and table_bytes <= (4 << 20)) else "recompute"

    if method == "table":
        table = _build_table(d_model, max_len, denom)
        fixed = 2 * table_bytes                              # (possibly) double-buffered const
        per_row = (2 * d_model * out_itemsize                # double-buffered output block
                   + max_len * 4                             # one-hot temp
                   + d_model * 4                             # f32 matmul result temp
                   + 2 * 4)                                  # double-buffered idx column
        tr = _choose_row_tile(n, per_row, fixed, out_itemsize,
                              vmem_budget_bytes=vmem_budget_bytes)
        grid = (pl.cdiv(n, tr),)
        cost = pl.CostEstimate(
            flops=2 * grid[0] * tr * max_len * d_model,
            transcendentals=0,
            bytes_accessed=n * 4 + table_bytes + n * d_model * out_itemsize)
        out = pl.pallas_call(
            _table_lookup_kernel,
            out_shape=jax.ShapeDtypeStruct((n, d_model), out_dtype),
            grid_spec=pl.GridSpec(
                grid=grid,
                in_specs=[
                    pl.BlockSpec((tr, 1), lambda i: (i, 0)),              # indices
                    pl.BlockSpec((max_len, d_model), lambda i: (0, 0)),   # table (const)
                ],
                out_specs=pl.BlockSpec((tr, d_model), lambda i: (i, 0)),
            ),
            compiler_params=pltpu.CompilerParams(
                dimension_semantics=("parallel",)),
            cost_estimate=cost,
        )(idx, table)
    else:
        # Per-feature constants, merged into one (2, d_model) input.
        j = np.arange(d_model)
        k = (j // 2).astype(np.float32)
        scale = np.exp(-2.0 * k / float(d_model) * math.log(float(denom)))
        phase = np.where(j % 2 == 0, 0.0, np.pi / 2.0)
        sp = jnp.asarray(np.stack([scale, phase]).astype(np.float32))     # (2, d_model)

        fixed = 2 * 2 * d_model * 4
        per_row = (2 * d_model * out_itemsize                # double-buffered output block
                   + 3 * d_model * 4                         # f32 temps (arg, sin, bcast)
                   + 2 * 4)                                  # double-buffered idx column
        tr = _choose_row_tile(n, per_row, fixed, out_itemsize,
                              vmem_budget_bytes=vmem_budget_bytes)
        grid = (pl.cdiv(n, tr),)
        cost = pl.CostEstimate(
            flops=2 * grid[0] * tr * d_model,
            transcendentals=grid[0] * tr * d_model,
            bytes_accessed=n * 4 + 2 * d_model * 4 + n * d_model * out_itemsize)
        out = pl.pallas_call(
            _sinusoid_recompute_kernel,
            out_shape=jax.ShapeDtypeStruct((n, d_model), out_dtype),
            grid_spec=pl.GridSpec(
                grid=grid,
                in_specs=[
                    pl.BlockSpec((tr, 1), lambda i: (i, 0)),              # indices
                    pl.BlockSpec((2, d_model), lambda i: (0, 0)),         # scale/phase (const)
                ],
                out_specs=pl.BlockSpec((tr, d_model), lambda i: (i, 0)),
            ),
            compiler_params=pltpu.CompilerParams(
                dimension_semantics=("parallel",)),
            cost_estimate=cost,
        )(idx, sp)

    return out.reshape(*orig_shape, d_model)


if __name__ == "__main__":
    key = jax.random.PRNGKey(0)
    B, S, d_model, max_len = 2, 8, 32, 128

    x = jax.random.randint(key, (B, S), 0, max_len, dtype=jnp.int32)

    # Reference: build the table exactly like the torch module, then gather.
    tbl = np.asarray(_build_table(d_model, max_len, 10000.0))
    ref = tbl[np.asarray(x)]

    # Default ("auto" -> table/MXU) path.
    y_tab = jax.block_until_ready(
        sinusoidal_positional_embedding(x, d_model, max_len=max_len))
    # Recompute (sin) path, used for large max_len.
    y_rec = jax.block_until_ready(
        sinusoidal_positional_embedding(x, d_model, max_len=max_len,
                                        method="recompute"))

    assert y_tab.shape == (B, S, d_model), y_tab.shape
    assert y_rec.shape == (B, S, d_model), y_rec.shape
    np.testing.assert_allclose(np.asarray(y_tab), ref, rtol=1e-4, atol=1e-4)
    np.testing.assert_allclose(np.asarray(y_rec), ref, rtol=1e-4, atol=1e-4)

    print("KERNEL_OK")
</pallas_src>

<mosaic_0001>
module attributes {stable_mosaic.version = 11 : i64} {
  func.func @_table_lookup_kernel(%arg0: i32, %arg1: memref<8x1xi32, #tpu.memory_space<vmem>>, %arg2: memref<128x32xf32, #tpu.memory_space<vmem>>, %arg3: memref<8x32xf32, #tpu.memory_space<vmem>>) attributes {dimension_semantics = [#tpu.dimension_semantics<parallel>], iteration_bounds = array<i64: 2>, scalar_prefetch = 0 : i64, scratch_operands = 0 : i64, tpu.core_type = #tpu.core_type<tc>, window_params = [{transform_indices = @transform_0, window_bounds = array<i64: 8, 1>}, {pipeline_mode = #tpu.pipeline_mode<synchronous>, transform_indices = @transform_1, window_bounds = array<i64: 128, 32>}, {transform_indices = @transform_2, window_bounds = array<i64: 8, 32>}]} {
    %c0 = arith.constant 0 : index
    %c0_0 = arith.constant 0 : index
    %0 = vector.load %arg1[%c0, %c0_0] : memref<8x1xi32, #tpu.memory_space<vmem>>, vector<8x1xi32>
    %1 = tpu.iota {dimensions = array<i32: 1>} : vector<8x128xi32>
    %2 = vector.broadcast %0 : vector<8x1xi32> to vector<8x128xi32>
    %3 = arith.cmpi eq, %1, %2 : vector<8x128xi32>
    %4 = arith.extui %3 : vector<8x128xi1> to vector<8x128xi32>
    %5 = arith.sitofp %4 : vector<8x128xi32> to vector<8x128xf32>
    %c0_1 = arith.constant 0 : index
    %c0_2 = arith.constant 0 : index
    %6 = vector.load %arg2[%c0_1, %c0_2] : memref<128x32xf32, #tpu.memory_space<vmem>>, vector<128x32xf32>
    %cst = arith.constant dense<0.000000e+00> : vector<8x32xf32>
    %7 = tpu.matmul %5, %6, %cst {dimension_numbers = #tpu.dot_dimension_numbers<[1], [0], [0], [1], [0, 0, 1, 1], [], []>, precision = #tpu.contract_precision<fp32>} : vector<8x128xf32>, vector<128x32xf32>, vector<8x32xf32> -> vector<8x32xf32>
    %c0_3 = arith.constant 0 : index
    %c0_4 = arith.constant 0 : index
    %8 = vector.load %arg3[%c0_3, %c0_4] : memref<8x32xf32, #tpu.memory_space<vmem>>, vector<8x32xf32>
    tpu.vector_store %arg3[%c0_3, %c0_4], %7 {strides = array<i32>} : memref<8x32xf32, #tpu.memory_space<vmem>>, vector<8x32xf32>,
    return
  }
  func.func @transform_0(%arg0: i32) -> (i32, i32) {
    %c0_i32 = arith.constant 0 : i32
    %c0_i32_0 = arith.constant 0 : i32
    return %arg0, %c0_i32 : i32, i32
  }
  func.func @transform_1(%arg0: i32) -> (i32, i32) {
    %c0_i32 = arith.constant 0 : i32
    %c0_i32_0 = arith.constant 0 : i32
    %c0_i32_1 = arith.constant 0 : i32
    return %c0_i32, %c0_i32_0 : i32, i32
  }
  func.func @transform_2(%arg0: i32) -> (i32, i32) {
    %c0_i32 = arith.constant 0 : i32
    %c0_i32_0 = arith.constant 0 : i32
    return %arg0, %c0_i32 : i32, i32
  }
}

</mosaic_0001>

<bundles_post_ra>
// kernel: tpu_custom_call.1
= control target key start
LH: loop header
LB: loop body
LE: loop exit
PB: predicated region body
PF: predicated region fallthrough
CT: control target
= control target key end

     0   :  { %7 = vsyncpa [#allocation3], 0  ;;  %s1941_s0 = inlined_call_operand.vmem [shape: s32[16,1], index: 0, kind: input, shape index: {}]   ;;  %s1942_s1 = inlined_call_operand.vmem [shape: f32[128,32], index: 1, kind: input, shape index: {}]   ;;  %s1943_s2 = inlined_call_operand.hbm [shape: f32[16,32], index: 2, kind: output, shape index: {}]  }
   0x1   :  { %9 = vsyncpa [#allocation3 + $0x1], 0  ;;  %s1489_s9 = smov 0   ;;  %s1491_s10 = smov 0  }
   0x2   :  { %s1493_s11 = smov 0   ;;  %s1495_s12 = smov 0  }
   0x3 LB: > { %s1510_s13 = sadd.s32 4294967295, %s1466_s12   ;;  %s880_s14 = sadd.s32 4294967294, %s1466_s12   ;;  %s1466_s12 = sphi %s1495_s12, %s1949_s12   ;;  %s1462_s11 = sphi %s1493_s11, %s1948_s11   ;;  %s1458_s10 = sphi %s1491_s10, %s1947_s10   ;;  %s1454_s9 = sphi %s1489_s9, %s1946_s9  }
   0x4   : > { %s1514_s15 = sadd.s32 1, %s1466_s12   ;;  %s69_s16 = sadd.s32 1, %s1462_s11 }
   0x5   : > { %s66_s17 = ssub.s32 %s1466_s12, %s1514_s15  ;;  %p79_p0 = scmp.ne.s32.totalorder %s1462_s11, %s1458_s10 }
   0x6   : > { %p67_p1 = scmp.eq.s32.totalorder %s66_s17, 0  ;;  %p80_p2 = scmp.eq.s32.totalorder %s1510_s13, 1 }
   0x7   : > { %p85_p3 = scmp.ne.s32.totalorder %s1458_s10, %s1454_s9  ;;  %p86_p4 = scmp.eq.s32.totalorder %s880_s14, 1 }
   0x8   : > { %s1525_s18 = scalar_select %p67_p1, %s1462_s11, %s69_s16  }
   0x9   : > { %p1527_p5 = por %p80_p2, %p79_p0  ;;  %p1531_p6 = por %p86_p4, %p85_p3 }
   0xa   : > { %p883_p7 = scmp.ge.s32.totalorder %s1466_s12, 1  ;;  %p114_p8 = scmp.lt.s32.totalorder %s1466_s12, 3 }
   0xc   : > { %p115_p9 = pnand %p883_p7, %p114_p8 }
   0xd   : > { %p135_p10 = scmp.lt.s32.totalorder (!%p115_p9), %s1510_s13, 1  ;;  %v148_v0 = vld [vmem:[%s1942_s1] sm:$0xff] (!%p115_p9)  ;;  %v149_v1 = vld [vmem:[%s1942_s1 + $0x8] sm:$0xff] (!%p115_p9)  ;;  %v150_v2 = vld [vmem:[%s1942_s1 + $0x10] sm:$0xff] (!%p115_p9)  ;;  %v1468_v3 = vmov (!%p115_p9), 0   ;;  %v1469_v4 = vmov (!%p115_p9), 0.0|0.0  }
   0xe   : > { %118 = sbr.rel (%p115_p9) target bundleno = 456 (0x1c8), region = 28  ;;  %1403 = vset.pattern.permute.xlu0 (!%p115_p9), %v1468_v3  ;;  %1278 = vmatprep.subr.bf16.mxu0 (!%p115_p9), %v1469_v4  ;;  %v165_v5 = vand.u32 (!%p115_p9), 4294901760, %v148_v0  ;;  %v168_v6 = vand.u32 (!%p115_p9), 4294901760, %v149_v1  ;;  %v151_v7 = vld [vmem:[%s1942_s1 + $0x18] sm:$0xff] (!%p115_p9)  ;;  %v171_v8 = vand.u32 (!%p115_p9), 4294901760, %v150_v2  ;;  %v152_v9 = vld [vmem:[%s1942_s1 + $0x20] sm:$0xff] (!%p115_p9) }
   0xf   : > { %v153_v10 = vld [vmem:[%s1942_s1 + $0x28] sm:$0xff] (!%p115_p9)  ;;  %1206 = vmatprep.subr.bf16.mxu1 (!%p115_p9), %v1469_v4  ;;  %v174_v11 = vand.u32 (!%p115_p9), 4294901760, %v151_v7  ;;  %v177_v12 = vand.u32 (!%p115_p9), 4294901760, %v152_v9  ;;  %v154_v14 = vld [vmem:[%s1942_s1 + $0x30] sm:$0xff] (!%p115_p9)  ;;  %v155_v15 = vld [vmem:[%s1942_s1 + $0x38] sm:$0xff] (!%p115_p9)  ;;  %vm1470_vm0 = vmmov (!%p115_p9), 0  }
  0x10   : > { %v180_v13 = vand.u32 (!%p115_p9), 4294901760, %v153_v10  ;;  %v1567_v16 = vpack.c.bf16 (!%p115_p9), %v168_v6, %v165_v5  ;;  %v1569_v17 = vsub.f32 (!%p115_p9), %v148_v0, %v165_v5  ;;  %v1571_v18 = vsub.f32 (!%p115_p9), %v149_v1, %v168_v6  ;;  %v1578_v20 = vld [vmem:[%s1942_s1 + $0x40] sm:$0xff] (!%p115_p9)  ;;  %v1583_v21 = vld [vmem:[%s1942_s1 + $0x48] sm:$0xff] (!%p115_p9)  ;;  %v1588_v22 = vld [vmem:[%s1942_s1 + $0x50] sm:$0xff] (!%p115_p9)  ;;  %s132_s17 = sand.u32 (!%p115_p9), 1, %s1458_s10   ;;  %s891_s22 = sshll.u32 (!%p115_p9), %s1510_s13, 7 }
  0x11   : > { %v1573_v19 = vsub.f32 (!%p115_p9), %v150_v2, %v171_v8  ;;  %v1590_v23 = vpack.c.bf16 (!%p115_p9), %v174_v11, %v171_v8  ;;  %v1592_v24 = vsub.f32 (!%p115_p9), %v151_v7, %v174_v11  ;;  %v1594_v25 = vsub.f32 (!%p115_p9), %v152_v9, %v177_v12  ;;  %v1599_v26 = vld [vmem:[%s1942_s1 + $0x58] sm:$0xff] (!%p115_p9)  ;;  %v1604_v27 = vld [vmem:[%s1942_s1 + $0x60] sm:$0xff] (!%p115_p9)  ;;  %v1622_v36 = vld [vmem:[%s1942_s1 + $0x68] sm:$0xff] (!%p115_p9)  ;;  %s884_s21 = sshll.u32 (!%p115_p9), %s132_s17, 3  ;;  %s1899_s27 = scalar_lea.hbm (!%p115_p9), %s1943_s2, %s891_s22 }
  0x12   : > { %1280 = vmatpush3.bf16.msra.mxu0 (!%p115_p9), %v1567_v16  ;;  %1208 = vmatpush3.bf16.msra.mxu1 (!%p115_p9), %v1567_v16  ;;  %v1611_v28 = vsub.f32 (!%p115_p9), %v153_v10, %v180_v13  ;;  %v183_v29 = vand.u32 (!%p115_p9), 4294901760, %v154_v14  ;;  %v186_v30 = vand.u32 (!%p115_p9), 4294901760, %v155_v15  ;;  %v189_v31 = vand.u32 (!%p115_p9), 4294901760, %v1578_v20  ;;  %v1635_v41 = vld [vmem:[%s1942_s1 + $0x70] sm:$0xff] (!%p115_p9)  ;;  %v1640_v42 = vld [vmem:[%s1942_s1 + $0x78] sm:$0xff] (!%p115_p9)  ;;  %s134_s23 = scalar_lea.vmem (!%p115_p9), [#allocation2], %s884_s21 }
  0x13   : > { %1281 = vmatprep.subr.bf16.mxu0 (!%p115_p9), %v1469_v4  ;;  %1209 = vmatprep.subr.bf16.mxu1 (!%p115_p9), %v1469_v4  ;;  %v192_v33 = vand.u32 (!%p115_p9), 4294901760, %v1583_v21  ;;  %v195_v34 = vand.u32 (!%p115_p9), 4294901760, %v1588_v22  ;;  %v198_v35 = vand.u32 (!%p115_p9), 4294901760, %v1599_v26  ;;  %v201_v40 = vand.u32 (!%p115_p9), 4294901760, %v1604_v27  ;;  %s821_s24 = sshll.u32 (!%p115_p9), %s134_s23, 4  ;;  %s808_s28 = scalar_lea.sflag (!%p115_p9), [#allocation3], %s132_s17  ;;  %s1901_s24 = int_to_ptr.vmem [resolvable:$true] %s821_s24 }
  0x14   : > { %v1624_v37 = vsub.f32 (!%p115_p9), %v154_v14, %v183_v29  ;;  %v1626_v38 = vsub.f32 (!%p115_p9), %v155_v15, %v186_v30  ;;  %v1629_v39 = vsub.f32 (!%p115_p9), %v1578_v20, %v189_v31  ;;  %v1650_v45 = vpack.c.bf16 (!%p115_p9), %v180_v13, %v177_v12  ;;  %s1404_s29 = scalar_lea.vmem (!%p115_p9), %s1901_s24, 128 }
  0x15   : > { %s136_s5 = scalar_select %p135_p10, %s1510_s13, 1  ;;  %v1643_v43 = vsub.f32 %v1583_v21, %v192_v33  ;;  %v1646_v44 = vsub.f32 %v1588_v22, %v195_v34  ;;  %v1653_v46 = vsub.f32 %v1599_v26, %v198_v35  ;;  %v204_v47 = vand.u32 4294901760, %v1622_v36 }
  0x16   : > { %1283 = vmatpush3.bf16.msra.mxu0 %v1590_v23  ;;  %1211 = vmatpush3.bf16.msra.mxu1 %v1590_v23  ;;  %v1659_v48 = vsub.f32 %v1604_v27, %v201_v40  ;;  %v207_v49 = vand.u32 4294901760, %v1635_v41  ;;  %v210_v50 = vand.u32 4294901760, %v1640_v42  ;;  %v1471_v52 = vmov 0.0   ;;  %p1405_p11 = scmp.ne.s32.totalorder %s1901_s24, %s1404_s29  ;;  %s1473_s13 = smov [#allocation2]  }
  0x17   : > { %s885_s25 = sshll.u32 %s136_s5, 3  ;;  %1284 = vmatprep.subr.bf16.mxu0 %v1469_v4  ;;  %1212 = vmatprep.subr.bf16.mxu1 %v1469_v4  ;;  %v1666_v51 = vsub.f32 %v1622_v36, %v204_v47  ;;  %v258_v53 = vand.u32 4294901760, %v1569_v17  ;;  %v265_v54 = vand.u32 4294901760, %v1571_v18  ;;  %v1674_v55 = vpack.c.bf16 %v186_v30, %v183_v29  ;;  %s1408_s30 = sshll.u32 %s1473_s13, 4  ;;  %s1409_s30 = int_to_ptr.vmem [resolvable:$false] %s1408_s30 }
  0x18   : > { %s138_s4 = scalar_lea.vmem %s1941_s0, %s885_s25  ;;  %1133 = vmatprep.mubr.msk.f32.mxu0 %vm1470_vm0, %v1471_v52  ;;  %1028 = vmatprep.mubr.msk.f32.mxu1 %vm1470_vm0, %v1471_v52  ;;  %v1679_v56 = vsub.f32 %v1635_v41, %v207_v49  ;;  %v1684_v57 = vsub.f32 %v1640_v42, %v210_v50  ;;  %v272_v61 = vand.u32 4294901760, %v1573_v19  ;;  %v279_v62 = vand.u32 4294901760, %v1592_v24  ;;  %p1406_p12 = pnand %p1405_p11, %p1527_p5 }
  0x19   : > { %v139_v32 = vld [vmem:[%s138_s4] sm:$0xff]  ;;  %v1688_v58 = vpack.c.bf16 %v265_v54, %v258_v53  ;;  %v259_v59 = vsub.f32 %v1569_v17, %v258_v53  ;;  %v266_v60 = vsub.f32 %v1571_v18, %v265_v54  ;;  %v1702_v5 = vpack.c.bf16 %v192_v33, %v189_v31  ;;  %s1410_s3 = scalar_lea.vmem %s1409_s30, 256  ;;  %p1411_p0 = scmp.lt.s32.totalorder %s1901_s24, %s1409_s30 }
  0x1a   : > { %143 = vperm.xlu0 %1403, %v139_v32   ;;  %1286 = vmatpush3.bf16.msra.mxu0 %v1650_v45  ;;  %v1696_v1 = vpack.c.bf16 %v279_v62, %v272_v61  ;;  %v273_v2 = vsub.f32 %v1573_v19, %v272_v61  ;;  %v280_v3 = vsub.f32 %v1592_v24, %v279_v62  ;;  %v286_v9 = vand.u32 4294901760, %v1594_v25  ;;  %p1407_p13 = pneg %p1406_p12  ;;  %p1412_p1 = scmp.lt.s32.totalorder %s1410_s3, %s1404_s29 }
  0x1b   : > { %1214 = vmatpush3.bf16.msra.mxu1 %v1650_v45  ;;  %1287 = vmatprep.subr.bf16.mxu0 %v1469_v4  ;;  %v260_v63 = vand.u32 4294901760, %v259_v59  ;;  %v267_v0 = vand.u32 4294901760, %v266_v60  ;;  %v293_v10 = vand.u32 4294901760, %v1611_v28  ;;  %v1718_v15 = vpack.c.bf16 %v198_v35, %v195_v34 }
  0x1c   : > { %1215 = vmatprep.subr.bf16.mxu1 %v1469_v4  ;;  %v274_v7 = vand.u32 4294901760, %v273_v2  ;;  %v281_v8 = vand.u32 4294901760, %v280_v3  ;;  %v287_v13 = vsub.f32 %v1594_v25, %v286_v9  ;;  %v300_v22 = vand.u32 4294901760, %v1624_v37  ;;  %p1413_p2 = por %p1412_p1, %p1411_p0 }
  0x1d   : > { %v1704_v6 = vpack.c.bf16 %v267_v0, %v260_v63  ;;  %v1712_v12 = vpack.c.bf16 %v293_v10, %v286_v9  ;;  %v294_v14 = vsub.f32 %v1611_v28, %v293_v10  ;;  %v307_v26 = vand.u32 4294901760, %v1626_v38 }
  0x1e   : > { %1289 = vmatpush3.bf16.msra.mxu0 %v1674_v55  ;;  %v1710_v11 = vpack.c.bf16 %v281_v8, %v274_v7  ;;  %v288_v20 = vand.u32 4294901760, %v287_v13  ;;  %v301_v31 = vsub.f32 %v1624_v37, %v300_v22  ;;  %v1734_v33 = vpack.c.bf16 %v204_v47, %v201_v40  ;;  %p1414_p3 = pnand %p1413_p2, %p1407_p13 }
  0x1f   : > { %1217 = vmatpush3.bf16.msra.mxu1 %v1674_v55  ;;  %1290 = vmatprep.subr.bf16.mxu0 %v1469_v4  ;;  %v295_v21 = vand.u32 4294901760, %v294_v14  ;;  %v1726_v30 = vpack.c.bf16 %v307_v26, %v300_v22  ;;  %v308_v32 = vsub.f32 %v1626_v38, %v307_v26  ;;  %v314_v36 = vand.u32 4294901760, %v1629_v39 }
  0x20   : > { %1218 = vmatprep.subr.bf16.mxu1 %v1469_v4  ;;  %v302_v34 = vand.u32 4294901760, %v301_v31  ;;  %v321_v53 = vand.u32 4294901760, %v1643_v43  ;;  %v1752_v40 = vpack.c.bf16 %v210_v50, %v207_v49  ;;  %v328_v62 = vand.u32 4294901760, %v1646_v44 }
  0x21   : > { %v1724_v29 = vpack.c.bf16 %v295_v21, %v288_v20  ;;  %v309_v35 = vand.u32 4294901760, %v308_v32  ;;  %v315_v60 = vsub.f32 %v1629_v39, %v314_v36  ;;  %v335_v63 = vand.u32 4294901760, %v1653_v46 }
  0x22   : > { %1292 = vmatpush3.bf16.msra.mxu0 %v1702_v5  ;;  %v1742_v59 = vpack.c.bf16 %v321_v53, %v314_v36  ;;  %v322_v27 = vsub.f32 %v1643_v43, %v321_v53  ;;  %v329_v41 = vsub.f32 %v1646_v44, %v328_v62  ;;  %v342_v3 = vand.u32 4294901760, %v1659_v48 }
  0x23   : > { %1220 = vmatpush3.bf16.msra.mxu1 %v1702_v5  ;;  %1293 = vmatprep.subr.bf16.mxu0 %v1469_v4  ;;  %v1740_v54 = vpack.c.bf16 %v309_v35, %v302_v34  ;;  %v316_v47 = vand.u32 4294901760, %v315_v60  ;;  %v1760_v2 = vpack.c.bf16 %v335_v63, %v328_v62  ;;  %v336_v42 = vsub.f32 %v1653_v46, %v335_v63 }
  0x24   : > { %1221 = vmatprep.subr.bf16.mxu1 %v1469_v4  ;;  %v323_v61 = vand.u32 4294901760, %v322_v27  ;;  %v330_v49 = vand.u32 4294901760, %v329_v41  ;;  %v349_v7 = vand.u32 4294901760, %v1666_v51  ;;  %v343_v10 = vsub.f32 %v1659_v48, %v342_v3 }
  0x25   : > { %v337_v50 = vand.u32 4294901760, %v336_v42  ;;  %v356_v21 = vand.u32 4294901760, %v1679_v56  ;;  %v363_v22 = vand.u32 4294901760, %v1684_v57  ;;  %v1255_v60 = vpack.c.bf16 %v1571_v18, %v1569_v17 }
  0x26   : > { %1295 = vmatpush3.bf16.msra.mxu0 %v1718_v15  ;;  %v1758_v0 = vpack.c.bf16 %v323_v61, %v316_v47  ;;  %v1321_v9 = vpack.c.bf16 %v349_v7, %v342_v3  ;;  %v350_v13 = vsub.f32 %v1666_v51, %v349_v7  ;;  %v344_v14 = vand.u32 4294901760, %v343_v10 }
  0x27   : > { %1223 = vmatpush3.bf16.msra.mxu1 %v1718_v15  ;;  %1296 = vmatprep.subr.bf16.mxu0 %v1469_v4  ;;  %v1246_v8 = vpack.c.bf16 %v337_v50, %v330_v49  ;;  %v1324_v31 = vpack.c.bf16 %v363_v22, %v356_v21  ;;  %v357_v32 = vsub.f32 %v1679_v56, %v356_v21  ;;  %v140_v18 = vlaneseq }
  0x28   : > { %1224 = vmatprep.subr.bf16.mxu1 %v1469_v4  ;;  %v351_v20 = vand.u32 4294901760, %v350_v13  ;;  %v364_v34 = vsub.f32 %v1684_v57, %v363_v22  ;;  %v1258_v27 = vpack.c.bf16 %v1592_v24, %v1573_v19  ;;  %v1261_v47 = vpack.c.bf16 %v1611_v28, %v1594_v25 }
  0x29   : > { %v358_v35 = vand.u32 4294901760, %v357_v32  ;;  %v1264_v61 = vpack.c.bf16 %v1626_v38, %v1624_v37  ;;  %v1267_v62 = vpack.c.bf16 %v1643_v43, %v1629_v39  ;;  %v1270_v63 = vpack.c.bf16 %v1653_v46, %v1646_v44 }
  0x2a   : > { %1298 = vmatpush3.bf16.msra.mxu0 %v1734_v33  ;;  %v1249_v26 = vpack.c.bf16 %v351_v20, %v344_v14  ;;  %v365_v36 = vand.u32 4294901760, %v364_v34  ;;  %v1273_v41 = vpack.c.bf16 %v1666_v51, %v1659_v48  ;;  %v1276_v17 = vpack.c.bf16 %v1684_v57, %v1679_v56 }
  0x2b   : > { %1226 = vmatpush3.bf16.msra.mxu1 %v1734_v33  ;;  %1299 = vmatprep.subr.bf16.mxu0 %v1469_v4  ;;  %v1792_v42 = vand.u32 127, %v140_v18  ;;  %vm805_vm2 = vcmask 261120  }
  0x2c   : > { %1227 = vmatprep.subr.bf16.mxu1 %v1469_v4  ;;  %v1252_v53 = vpack.c.bf16 %v365_v36, %v358_v35 }
  0x2e   : > { %1301 = vmatpush3.bf16.msra.mxu0 %v1752_v40 }
  0x2f   : > { %1229 = vmatpush3.bf16.msra.mxu1 %v1752_v40  ;;  %1302 = vmatprep.subr.bf16.mxu0 %v1469_v4 }
  0x30   : > { %1230 = vmatprep.subr.bf16.mxu1 %v1469_v4 }
  0x99   : > { %v1794_v49 = vpop.permute.xlu0 %143 }
  0x9a   : > { %vm145_vm1 = vcmp.eq.s32.totalorder %v1792_v42, %v1794_v49 }
  0x9b   : > { %v886_v50 = vsel %vm145_vm1, 1.0, %v1471_v52 }
  0x9c   : > { %v1802_v3 = vsub.f32 %v886_v50, %v886_v50 }
  0x9e   : > { %v247_v7 = vand.u32 4294901760, %v1802_v3 }
  0xa0   : > { %1134 = vmatmul.mubr.f32.vlgmr.msra.gmra.mrb[0].mxu0 %v247_v7  ;;  %v248_v10 = vsub.f32 %v1802_v3, %v247_v7 }
  0xa1   : > { %1304 = vmatpush3.bf16.msra.mxu0 %v1688_v58  ;;  %1168 = vmatprep.mubr.msk.f32.mxu0 %vm1470_vm0, %v1471_v52  ;;  %v1472_v58 = vmov 1.0  }
  0xa2   : > { %1305 = vmatprep.subr.bf16.mxu0 %v1469_v4  ;;  %v249_v13 = vand.u32 4294901760, %v248_v10 }
  0xa4   : > { %1029 = vmatmul.mubr.f32.vlgmr.msra.gmra.mrb[0].mxu1 %v249_v13 }
  0xa5   : > { %1232 = vmatpush3.bf16.msra.mxu1 %v1704_v6  ;;  %1307 = vmatpush3.bf16.msra.mxu0 %v1696_v1 }
  0xa6   : > { %1233 = vmatprep.subr.bf16.mxu1 %v1469_v4  ;;  %1308 = vmatprep.subr.bf16.mxu0 %v1469_v4 }
  0xa7   : > { %1063 = vmatprep.mubr.msk.f32.mxu1 %vm1470_vm0, %v1471_v52 }
  0xa9   : > { %1235 = vmatpush3.bf16.msra.mxu1 %v1710_v11  ;;  %1310 = vmatpush3.bf16.msra.mxu0 %v1712_v12 }
  0xaa   : > { %1236 = vmatprep.subr.bf16.mxu1 %v1469_v4  ;;  %1311 = vmatprep.subr.bf16.mxu0 %v1469_v4 }
  0xad   : > { %1238 = vmatpush3.bf16.msra.mxu1 %v1724_v29  ;;  %1313 = vmatpush3.bf16.msra.mxu0 %v1726_v30 }
  0xae   : > { %1239 = vmatprep.subr.bf16.mxu1 %v1469_v4  ;;  %1314 = vmatprep.subr.bf16.mxu0 %v1469_v4 }
  0xb1   : > { %1241 = vmatpush3.bf16.msra.mxu1 %v1740_v54  ;;  %1316 = vmatpush3.bf16.msra.mxu0 %v1742_v59 }
  0xb2   : > { %1242 = vmatprep.subr.bf16.mxu1 %v1469_v4  ;;  %1317 = vmatprep.subr.bf16.mxu0 %v1469_v4 }
  0xb5   : > { %1244 = vmatpush3.bf16.msra.mxu1 %v1758_v0  ;;  %1319 = vmatpush3.bf16.msra.mxu0 %v1760_v2 }
  0xb6   : > { %1245 = vmatprep.subr.bf16.mxu1 %v1469_v4  ;;  %1320 = vmatprep.subr.bf16.mxu0 %v1469_v4 }
  0xb9   : > { %1247 = vmatpush3.bf16.msra.mxu1 %v1246_v8  ;;  %1322 = vmatpush3.bf16.msra.mxu0 %v1321_v9 }
  0xba   : > { %1248 = vmatprep.subr.bf16.mxu1 %v1469_v4  ;;  %1323 = vmatprep.subr.bf16.mxu0 %v1469_v4 }
  0xbd   : > { %1250 = vmatpush3.bf16.msra.mxu1 %v1249_v26  ;;  %1325 = vmatpush3.bf16.msra.mxu0 %v1324_v31 }
  0xbe   : > { %1251 = vmatprep.subr.bf16.mxu1 %v1469_v4  ;;  %1326 = vmatprep.subr.bf16.mxu0 %v1469_v4 }
  0xc0   : > { %1169 = vmatmul.mubr.msk.f32.vlgmr.msra.gmra.mrb[0].mxu0 %vm145_vm1, %v1472_v58 }
  0xc1   : > { %1253 = vmatpush3.bf16.msra.mxu1 %v1252_v53  ;;  %1328 = vmatpush3.bf16.msra.mxu0 %v1567_v16 }
  0xc2   : > { %1254 = vmatprep.subr.bf16.mxu1 %v1469_v4  ;;  %1329 = vmatprep.subr.bf16.mxu0 %v1469_v4 }
  0xc3   : > { %1203 = vmatprep.mubr.msk.f32.mxu0 %vm1470_vm0, %v1471_v52 }
  0xc4   : > { %1064 = vmatmul.mubr.msk.f32.vlgmr.msra.gmra.mrb[0].mxu1 %vm145_vm1, %v1472_v58 }
  0xc5   : > { %1256 = vmatpush3.bf16.msra.mxu1 %v1255_v60  ;;  %1331 = vmatpush3.bf16.msra.mxu0 %v1590_v23 }
  0xc6   : > { %1257 = vmatprep.subr.bf16.mxu1 %v1469_v4  ;;  %1332 = vmatprep.subr.bf16.mxu0 %v1469_v4 }
  0xc7   : > { %1098 = vmatprep.mubr.msk.f32.mxu1 %vm1470_vm0, %v1471_v52 }
  0xc9   : > { %1259 = vmatpush3.bf16.msra.mxu1 %v1258_v27  ;;  %1334 = vmatpush3.bf16.msra.mxu0 %v1650_v45 }
  0xca   : > { %1260 = vmatprep.subr.bf16.mxu1 %v1469_v4  ;;  %1335 = vmatprep.subr.bf16.mxu0 %v1469_v4 }
  0xcd   : > { %1262 = vmatpush3.bf16.msra.mxu1 %v1261_v47  ;;  %1337 = vmatpush3.bf16.msra.mxu0 %v1674_v55 }
  0xce   : > { %1263 = vmatprep.subr.bf16.mxu1 %v1469_v4  ;;  %1338 = vmatprep.subr.bf16.mxu0 %v1469_v4 }
  0xd1   : > { %1265 = vmatpush3.bf16.msra.mxu1 %v1264_v61  ;;  %1340 = vmatpush3.bf16.msra.mxu0 %v1702_v5 }
  0xd2   : > { %1266 = vmatprep.subr.bf16.mxu1 %v1469_v4  ;;  %1341 = vmatprep.subr.bf16.mxu0 %v1469_v4 }
  0xd5   : > { %1268 = vmatpush3.bf16.msra.mxu1 %v1267_v62  ;;  %1343 = vmatpush3.bf16.msra.mxu0 %v1718_v15 }
  0xd6   : > { %1269 = vmatprep.subr.bf16.mxu1 %v1469_v4  ;;  %1344 = vmatprep.subr.bf16.mxu0 %v1469_v4 }
  0xd9   : > { %1271 = vmatpush3.bf16.msra.mxu1 %v1270_v63  ;;  %1346 = vmatpush3.bf16.msra.mxu0 %v1734_v33 }
  0xda   : > { %1272 = vmatprep.subr.bf16.mxu1 %v1469_v4  ;;  %1347 = vmatprep.subr.bf16.mxu0 %v1469_v4 }
  0xdd   : > { %1274 = vmatpush3.bf16.msra.mxu1 %v1273_v41  ;;  %1349 = vmatpush3.bf16.msra.mxu0 %v1752_v40 }
  0xde   : > { %1275 = vmatprep.subr.bf16.mxu1 %v1469_v4 }
  0xe0   : > { %1204 = vmatmul.mubr.msk.f32.vlgmr.msra.gmra.mrb[0].mxu0 %vm145_vm1, %v1472_v58 }
  0xe1   : > { %1277 = vmatpush3.bf16.msra.mxu1 %v1276_v17 }
  0xe4   : > { %1099 = vmatmul.mubr.f32.vlgmr.msra.gmra.mrb[0].mxu1 %v1802_v3 }
 0x1b3   : > { %v801_v16 = vpop.f32.mrb[0].mxu0 }
 0x1b4   : > { %v1205_v19 = vpop.f32.mrb[1].mxu0 }
 0x1b7   : > { %v506_v23 = vpop.f32.mrb[0].mxu1 }
 0x1b8   : > { %v1350_v4 = vadd.f32 %v801_v16, %v506_v23  ;;  %v1100_v24 = vpop.f32.mrb[1].mxu1 }
 0x1ba   : > { %806 = vst.msk [vmem:[%s134_s23] sm:$0xff] %vm805_vm2, %v1350_v4 }
 0x1bb   : > { %1417 = shalt.err (!%p1414_p3)
}
 0x1bc   : > { %s1418_s4 = scalar_lea.hbm %s1899_s27, 128  ;;  %s1422_s7 = scalar_lea.hbm %s1943_s2, 256 }
 0x1bd   : > { %p1419_p4 = scmp.ne.s32.totalorder %s1899_s27, %s1418_s4  ;;  %p1423_p9 = scmp.lt.u32.totalorder %s1899_s27, %s1943_s2 }
 0x1be   : > { %p1424_p10 = scmp.lt.u32.totalorder %s1422_s7, %s1418_s4  ;;  %p1426_p12 = scmp.lt.u32.totalorder %s1418_s4, %s1899_s27 }
 0x1bf   : > { %p1420_p7 = pnand %p1419_p4, %p1527_p5 }
 0x1c0   : > { %p1425_p11 = por %p1424_p10, %p1423_p9 }
 0x1c1   : > { %p1421_p8 = pneg %p1420_p7 }
 0x1c2   : > { %p1427_p13 = por %p1426_p12, %p1425_p11 }
 0x1c4   : > { %p1428_p0 = pnand %p1427_p13, %p1421_p8 }
 0x1c6   : > { %1431 = shalt.err (!%p1428_p0)
}
 0x1c7   : > { %1359 = dma.vmem_to_hbm [thread:$0]  (%p1527_p5), %s1901_s24, 128, %s1899_s27, %s808_s28  }
 0x1c8 PF: > { %p1365_p1 = scmp.ge.s32.totalorder %s1466_s12, 2  ;;  %s833_s16 = sand.u32 1, %s1454_s9  }
 0x1c9   : > { %s834_s17 = scalar_lea.sflag [#allocation3], %s833_s16 }
 0x1ca   : > { %p1362_p2 = pnand %p1365_p1, %p1531_p6 }
 0x1cc   : > { %1449 = dma.done.wait (!%p1362_p2), %s834_s17, 128  }
 0x1cd   : > { %1451 = vsyncadd (!%p1362_p2), %s834_s17, 4294967168  ;;  %p12_p3 = scmp.ge.s32.totalorder %s1514_s15, 4   ;;  %s1946_s9 = smov %s1458_s10 }
 0x1ce   : > { %s1947_s10 = smov %s1462_s11  ;;  %s1948_s11 = smov %s1525_s18 }
 0x1cf   : > { %s1949_s12 = smov %s1514_s15  ;;  %14 = sbr.rel (!%p12_p3) target bundleno = 3 (0x3), region = 63 }
 0x1d6   :  { %839 = vsyncpa [#allocation3], 1 }
 0x1d7   :  { %841 = vsyncpa [#allocation3 + $0x1], 1 }

</bundles_post_ra>
